<compile_context>
chip_gen: v7x
topology: tpu7x:2x2x1
jax: 0.10.0
libtpu: 0.0.40
codegen_flags: <defaults>
</compile_context>

<pallas_src>
import functools

import jax
import jax.numpy as jnp
from jax.experimental import pallas as pl
from jax.experimental.pallas import tpu as pltpu


# ----------------------------------------------------------------------------
# Tiling / chip configuration
# ----------------------------------------------------------------------------
def _round_up(v, m):
    return (v + m - 1) // m * m


def _chip_tile_config():
    """Per-generation tile caps + VMEM budget (conservative fallback)."""
    kind = ""
    try:
        kind = jax.devices()[0].device_kind.lower()
    except Exception:
        pass
    if "v5 lite" in kind or "v5e" in kind or "v5lite" in kind:
        # v5e: slowest HBM -> wide N tiles so the (im2col) LHS streams once.
        return {"tm": 512, "tn": 512, "tk": 256, "vmem": 100 * 1024 * 1024, "two_tc": False}
    if "v6" in kind:
        # v6e: 128 MiB VMEM -> one (i,j) tile covers cout<=1024, big K blocks.
        return {"tm": 512, "tn": 1024, "tk": 1024, "vmem": 100 * 1024 * 1024, "two_tc": False}
    if "7" in kind:
        # v7x: 64 MiB VMEM/TC, 2 TCs -> moderate tiles, keep >=2 output blocks.
        return {"tm": 256, "tn": 512, "tk": 1024, "vmem": 44 * 1024 * 1024, "two_tc": True}
    return {"tm": 256, "tn": 512, "tk": 512, "vmem": 48 * 1024 * 1024, "two_tc": False}


_CFG = _chip_tile_config()


def _pick_tile(dim, cap, align):
    """Tile size (multiple of `align`, <= cap) minimizing padding waste.

    Returns (tile, padded_dim) with padded_dim % tile == 0.
    """
    padded_min = _round_up(dim, align)
    if padded_min <= cap:
        return padded_min, padded_min
    candidates = [(_round_up(dim, t), -t) for t in range(align, cap + 1, align)]
    padded, neg_t = min(candidates)
    return -neg_t, padded


def _pick_k(kdim, cap):
    """K tiling (lane dim of the LHS block, sublane dim of the RHS block)."""
    if kdim % 128 == 0:
        return _pick_tile(kdim, cap, 128)
    if kdim <= 128:
        return kdim, kdim                 # e.g. cin=64 1x1 convs: full-dim K, no pad
    return _pick_tile(kdim, cap, 128)     # zero-pad K (stem 147 -> 256, 576 -> 640)


def _pick_n(n, cap):
    """N tiling (lane dim of the RHS/output blocks)."""
    if n % 128 == 0:
        return _pick_tile(n, cap, 128)
    # cout=64 convs / num_classes FC: full-dim N block, no padding, no slice-back.
    return n, n


# ----------------------------------------------------------------------------
# Pallas kernels
# ----------------------------------------------------------------------------
def _mm_kernel(*refs, relu, use_residual):
    """Grid-tiled matmul: acc += x@w over the K axis; fused affine epilogue."""
    if use_residual:
        x_ref, w_ref, b_ref, r_ref, o_ref, acc_ref = refs
    else:
        x_ref, w_ref, b_ref, o_ref, acc_ref = refs
        r_ref = None

    @pl.when(pl.program_id(2) == 0)
    def _():
        acc_ref[...] = jnp.zeros_like(acc_ref)

    acc_ref[...] += jnp.dot(x_ref[...], w_ref[...],
                            preferred_element_type=jnp.float32)

    @pl.when(pl.program_id(2) == pl.num_programs(2) - 1)
    def _():
        out = acc_ref[...] + b_ref[...]          # folded-BN bias
        if use_residual:
            out = out + r_ref[...].astype(jnp.float32)   # fused residual add
        if relu:
            out = jnp.maximum(out, 0.0)
        o_ref[...] = out.astype(o_ref.dtype)


def _maxpool_kernel(a_ref, b_ref, c_ref, d_ref, o_ref):
    """3x3/s2/p1 max pool from even/odd phase planes.

    a/b/c/d: (1, ho+1, wo+1, C) with a[i,j]=xp[2i,2j], b=xp[2i,2j+1],
    c=xp[2i+1,2j], d=xp[2i+1,2j+1]; o: (1, ho, wo, C).
    """
    ho, wo = o_ref.shape[1], o_ref.shape[2]
    a = a_ref[...]
    b = b_ref[...]
    c = c_ref[...]
    d = d_ref[...]
    m = jnp.maximum
    out = m(m(a[:, :ho, :wo], b[:, :ho, :wo]), m(c[:, :ho, :wo], d[:, :ho, :wo]))
    out = m(out, m(a[:, :ho, 1:wo + 1], c[:, :ho, 1:wo + 1]))   # col 2j+2, rows 2i..2i+1
    out = m(out, m(a[:, 1:ho + 1, :wo], b[:, 1:ho + 1, :wo]))   # row 2i+2, cols 2j..2j+1
    out = m(out, a[:, 1:ho + 1, 1:wo + 1])                       # row 2i+2, col 2j+2
    o_ref[...] = out


def _gap_kernel(x_ref, o_ref):
    """x_ref: (nt, HW, C) bf16; o_ref: (nt, C) = mean over HW in f32."""
    o_ref[...] = jnp.mean(x_ref[...].astype(jnp.float32), axis=1).astype(o_ref.dtype)


# ----------------------------------------------------------------------------
# Pallas wrappers
# ----------------------------------------------------------------------------
@functools.partial(jax.jit, static_argnames=("relu", "out_dtype"))
def mm_affine(x, w, bias, residual=None, *, relu=True, out_dtype=jnp.bfloat16):
    """out = [relu]((x @ w) + bias [+ residual]) via a tiled, pipelined matmul.

    `w` is pre-padded along K and pre-cast to bf16 at init; `bias` is f32 (1, N).
    """
    m, kdim = x.shape
    kp, n = w.shape                                   # padded K, true output width
    tm, mp = _pick_tile(m, _CFG["tm"], 16)            # bf16 packs 2 rows / sublane
    tk, kp_chk = _pick_k(kdim, _CFG["tk"])
    assert kp_chk == kp, (kdim, kp_chk, kp)
    tn, np_ = _pick_n(n, _CFG["tn"])
    assert np_ == n, (n, np_)

    # v7x: keep >= 2 output blocks so the 'parallel' axes shard across both TCs.
    if _CFG["two_tc"] and (mp // tm) * (n // tn) < 2 and m > 16:
        tm, mp = _pick_tile(m, max(16, _round_up(tm // 2, 16)), 16)

    xb = x if x.dtype == jnp.bfloat16 else x.astype(jnp.bfloat16)
    if mp > m or kp > kdim:
        xb = jnp.pad(xb, ((0, mp - m), (0, kp - kdim)))

    args = [xb, w, bias]
    in_specs = [
        pl.BlockSpec((tm, tk), lambda i, j, k: (i, k)),
        pl.BlockSpec((tk, tn), lambda i, j, k: (k, j)),
        pl.BlockSpec((1, tn), lambda i, j, k: (0, j)),
    ]
    use_residual = residual is not None
    if use_residual:
        rb = residual if residual.dtype == jnp.bfloat16 else residual.astype(jnp.bfloat16)
        if mp > m:
            rb = jnp.pad(rb, ((0, mp - m), (0, 0)))
        args.append(rb)
        in_specs.append(pl.BlockSpec((tm, tn), lambda i, j, k: (i, j)))

    kernel = functools.partial(_mm_kernel, relu=relu, use_residual=use_residual)
    out = pl.pallas_call(
        kernel,
        out_shape=jax.ShapeDtypeStruct((mp, n), out_dtype),
        grid_spec=pltpu.PrefetchScalarGridSpec(
            num_scalar_prefetch=0,
            grid=(mp // tm, n // tn, kp // tk),
            in_specs=in_specs,
            out_specs=pl.BlockSpec((tm, tn), lambda i, j, k: (i, j)),
            scratch_shapes=[pltpu.VMEM((tm, tn), jnp.float32)],
        ),
        compiler_params=pltpu.CompilerParams(
            dimension_semantics=("parallel", "parallel", "arbitrary"),
            vmem_limit_bytes=_CFG["vmem"],
        ),
    )(*args)
    if mp > m:
        out = out[:m]
    return out


def _extract_patches(x, kh, kw, stride, padding):
    """x: (N,H,W,C) bf16 -> (N,Ho,Wo,kh*kw,C) im2col patches (plain-JAX glue).

    TODO(synk): stream the kh*kw shifted windows through the matmul K grid axis
    instead of materializing the (bf16) im2col tensor in HBM.
    """
    n, h, w, c = x.shape
    xp = jnp.pad(x, ((0, 0), (padding, padding), (padding, padding), (0, 0)))
    ho = (h + 2 * padding - kh) // stride + 1
    wo = (w + 2 * padding - kw) // stride + 1
    cols = []
    for ky in range(kh):
        for kx in range(kw):
            cols.append(xp[:, ky:ky + stride * ho:stride, kx:kx + stride * wo:stride, :])
    patches = jnp.stack(cols, axis=3)  # (n, ho, wo, kh*kw, c)
    return patches.reshape(n, ho, wo, kh * kw, c), ho, wo


@functools.partial(jax.jit, static_argnames=("kh", "kw", "stride", "padding", "relu"))
def conv_bn(x, w, bias, residual=None, *, kh, kw, stride=1, padding=0, relu=True):
    """NHWC bf16 conv + folded BN (+ residual + ReLU) as one tiled Pallas matmul."""
    n = x.shape[0]
    cin = x.shape[3]
    cout = w.shape[1]
    if kh == 1 and kw == 1 and padding == 0:
        # TODO(synk): fold the stride into the LHS DMA instead of an XLA strided slice.
        xs = x if stride == 1 else x[:, ::stride, ::stride, :]
        ho, wo = xs.shape[1], xs.shape[2]
        cols = xs.reshape(n * ho * wo, cin)
    else:
        patches, ho, wo = _extract_patches(x, kh, kw, stride, padding)
        cols = patches.reshape(n * ho * wo, kh * kw * cin)
    res = None if residual is None else residual.reshape(n * ho * wo, cout)
    y = mm_affine(cols, w, bias, residual=res, relu=relu, out_dtype=jnp.bfloat16)
    return y.reshape(n, ho, wo, cout)


@jax.jit
def maxpool_3x3_s2(x):
    """MaxPool2d(kernel=3, stride=2, padding=1) on NHWC bf16.

    The padded image is split into its 4 even/odd row/col phases (~1x data, vs
    the 9x stacked-patch staging it replaces); the per-image Pallas kernel does
    the 9-term window max with contiguous slices only.
    """
    n, h, w, c = x.shape
    ho = (h - 1) // 2 + 1
    wo = (w - 1) // 2 + 1
    xp = jnp.pad(x, ((0, 0), (1, 2 * ho + 1 - h), (1, 2 * wo + 1 - w), (0, 0)),
                 constant_values=-jnp.inf)
    a = xp[:, 0::2, 0::2, :]      # xp[2i,   2j  ]
    b = xp[:, 0::2, 1::2, :]      # xp[2i,   2j+1]
    cph = xp[:, 1::2, 0::2, :]    # xp[2i+1, 2j  ]
    d = xp[:, 1::2, 1::2, :]      # xp[2i+1, 2j+1]

    in_spec = pl.BlockSpec((1, ho + 1, wo + 1, c), lambda i: (i, 0, 0, 0))
    return pl.pallas_call(
        _maxpool_kernel,
        out_shape=jax.ShapeDtypeStruct((n, ho, wo, c), x.dtype),
        grid_spec=pltpu.PrefetchScalarGridSpec(
            num_scalar_prefetch=0,
            grid=(n,),
            in_specs=[in_spec, in_spec, in_spec, in_spec],
            out_specs=pl.BlockSpec((1, ho, wo, c), lambda i: (i, 0, 0, 0)),
        ),
        compiler_params=pltpu.CompilerParams(
            dimension_semantics=("parallel",),
            vmem_limit_bytes=_CFG["vmem"],
        ),
    )(a, b, cph, d)


@jax.jit
def global_avgpool(x):
    """AdaptiveAvgPool2d((1,1)) on NHWC bf16 -> (N, C) bf16, tiled over N."""
    n, h, w, c = x.shape
    hw = h * w
    xr = x.reshape(n, hw, c)
    nt, npad = _pick_tile(n, 64, 8)
    if npad > n:
        xr = jnp.pad(xr, ((0, npad - n), (0, 0), (0, 0)))
    # TODO(synk): also tile HW (grid reduction) for very large spatial extents.
    out = pl.pallas_call(
        _gap_kernel,
        out_shape=jax.ShapeDtypeStruct((npad, c), jnp.bfloat16),
        grid_spec=pltpu.PrefetchScalarGridSpec(
            num_scalar_prefetch=0,
            grid=(npad // nt,),
            in_specs=[pl.BlockSpec((nt, hw, c), lambda i: (i, 0, 0))],
            out_specs=pl.BlockSpec((nt, c), lambda i: (i, 0)),
        ),
        compiler_params=pltpu.CompilerParams(
            dimension_semantics=("parallel",),
            vmem_limit_bytes=_CFG["vmem"],
        ),
    )(xr)
    return out[:n]


# ----------------------------------------------------------------------------
# ResNet50 architecture (torchvision layout), synthetic deterministic params
# ----------------------------------------------------------------------------
_LAYER_CFG = [(64, 3, 1), (128, 4, 2), (256, 6, 2), (512, 3, 2)]  # (planes, blocks, stride)
_EXPANSION = 4


def _conv_bn_param(nk, kh, kw, cin, cout):
    """BN folded into the conv weight; matrix form, K pre-padded, bf16 pre-cast."""
    std = (2.0 / (kh * kw * cin)) ** 0.5
    w = jax.random.normal(nk(), (kh, kw, cin, cout), jnp.float32) * std
    scale = 1.0 + 0.01 * jax.random.normal(nk(), (cout,), jnp.float32)
    bias = 0.01 * jax.random.normal(nk(), (cout,), jnp.float32)
    kdim = kh * kw * cin
    wm = (w * scale[None, None, None, :]).reshape(kdim, cout)
    _, kp = _pick_k(kdim, _CFG["tk"])
    if kp > kdim:
        wm = jnp.pad(wm, ((0, kp - kdim), (0, 0)))
    _, npad = _pick_n(cout, _CFG["tn"])
    assert npad == cout, (cout, npad)     # every ResNet50 cout needs no N padding
    return {"w": wm.astype(jnp.bfloat16),
            "b": bias.reshape(1, cout),
            "kh": kh, "kw": kw}


def init_params(key, num_classes):
    keys = iter(jax.random.split(key, 256))

    def nk():
        return next(keys)

    params = {"stem": _conv_bn_param(nk, 7, 7, 3, 64)}

    layers = []
    inplanes = 64
    for planes, nblocks, stride in _LAYER_CFG:
        blocks = []
        for bi in range(nblocks):
            s = stride if bi == 0 else 1
            blk = {
                "stride": s,
                "conv1": _conv_bn_param(nk, 1, 1, inplanes, planes),
                "conv2": _conv_bn_param(nk, 3, 3, planes, planes),
                "conv3": _conv_bn_param(nk, 1, 1, planes, planes * _EXPANSION),
            }
            if s != 1 or inplanes != planes * _EXPANSION:
                blk["down"] = _conv_bn_param(nk, 1, 1, inplanes, planes * _EXPANSION)
            inplanes = planes * _EXPANSION
            blocks.append(blk)
        layers.append(blocks)
    params["layers"] = layers

    fc_w = jax.random.normal(nk(), (2048, num_classes), jnp.float32) * (1.0 / 2048.0) ** 0.5
    params["fc"] = {"w": fc_w.astype(jnp.bfloat16),
                    "b": jnp.zeros((1, num_classes), jnp.float32)}
    return params


def bottleneck(x, blk):
    s = blk["stride"]
    c1, c2, c3 = blk["conv1"], blk["conv2"], blk["conv3"]
    out = conv_bn(x, c1["w"], c1["b"], kh=1, kw=1, stride=1, padding=0, relu=True)
    out = conv_bn(out, c2["w"], c2["b"], kh=3, kw=3, stride=s, padding=1, relu=True)
    if "down" in blk:
        dn = blk["down"]
        identity = conv_bn(x, dn["w"], dn["b"], kh=1, kw=1, stride=s, padding=0, relu=False)
    else:
        identity = x
    # conv3 + folded-BN bias + residual add + final ReLU fused into one kernel.
    out = conv_bn(out, c3["w"], c3["b"], residual=identity,
                  kh=1, kw=1, stride=1, padding=0, relu=True)
    return out


def forward(params, x_nchw):
    # Input is PyTorch-style NCHW; transpose to NHWC, keep bf16 end-to-end.
    x = jnp.transpose(x_nchw, (0, 2, 3, 1)).astype(jnp.bfloat16)
    st = params["stem"]
    x = conv_bn(x, st["w"], st["b"], kh=7, kw=7, stride=2, padding=3, relu=True)
    x = maxpool_3x3_s2(x)
    for blocks in params["layers"]:
        for blk in blocks:
            x = bottleneck(x, blk)
    feat = global_avgpool(x)  # (N, 2048) == torch.squeeze of (N, 2048, 1, 1) for N > 1
    fc = params["fc"]
    logits = mm_affine(feat, fc["w"], fc["b"], relu=False, out_dtype=jnp.float32)
    return logits


if __name__ == "__main__":
    num_classes = 10
    key = jax.random.PRNGKey(0)
    pkey, xkey = jax.random.split(key)

    params = init_params(pkey, num_classes)
    x = jax.random.normal(xkey, (2, 3, 32, 32), jnp.float32)  # NCHW, small ImageNet-like input

    logits = forward(params, x)
    logits = jax.block_until_ready(logits)

    assert logits.shape == (2, num_classes), logits.shape
    assert bool(jnp.all(jnp.isfinite(logits)))
    print("KERNEL_OK")
</pallas_src>

<mosaic_0001>
module attributes {stable_mosaic.version = 11 : i64} {
  func.func @_mm_kernel(%arg0: i32, %arg1: i32, %arg2: i32, %arg3: memref<256x256xbf16, #tpu.memory_space<vmem>>, %arg4: memref<256x64xbf16, #tpu.memory_space<vmem>>, %arg5: memref<1x64xf32, #tpu.memory_space<vmem>>, %arg6: memref<256x64xbf16, #tpu.memory_space<vmem>>, %arg7: memref<256x64xf32, #tpu.memory_space<vmem>>) attributes {dimension_semantics = [#tpu.dimension_semantics<parallel>, #tpu.dimension_semantics<parallel>, #tpu.dimension_semantics<arbitrary>], iteration_bounds = array<i64: 2, 1, 1>, scalar_prefetch = 0 : i64, scratch_operands = 1 : i64, tpu.core_type = #tpu.core_type<tc>, window_params = [{transform_indices = @transform_0, window_bounds = array<i64: 256, 256>}, {transform_indices = @transform_1, window_bounds = array<i64: 256, 64>}, {transform_indices = @transform_2, window_bounds = array<i64: 1, 64>}, {transform_indices = @transform_3, window_bounds = array<i64: 256, 64>}]} {
    %c0_i32 = arith.constant 0 : i32
    %0 = arith.cmpi eq, %arg2, %c0_i32 : i32
    %1 = arith.extui %0 : i1 to i32
    %c0_i32_0 = arith.constant 0 : i32
    %2 = arith.cmpi ne, %1, %c0_i32_0 : i32
    scf.if %2 {
      %cst_10 = arith.constant 0.000000e+00 : f32
      %12 = vector.broadcast %cst_10 : f32 to vector<256x64xf32>
      %c0_11 = arith.constant 0 : index
      %c0_12 = arith.constant 0 : index
      %13 = vector.load %arg7[%c0_11, %c0_12] : memref<256x64xf32, #tpu.memory_space<vmem>>, vector<256x64xf32>
      tpu.vector_store %arg7[%c0_11, %c0_12], %12 {strides = array<i32>} : memref<256x64xf32, #tpu.memory_space<vmem>>, vector<256x64xf32>,
    } else {
    }
    %c0 = arith.constant 0 : index
    %c0_1 = arith.constant 0 : index
    %3 = vector.load %arg7[%c0, %c0_1] : memref<256x64xf32, #tpu.memory_space<vmem>>, vector<256x64xf32>
    %c0_2 = arith.constant 0 : index
    %c0_3 = arith.constant 0 : index
    %4 = vector.load %arg3[%c0_2, %c0_3] : memref<256x256xbf16, #tpu.memory_space<vmem>>, vector<256x256xbf16>
    %c0_4 = arith.constant 0 : index
    %c0_5 = arith.constant 0 : index
    %5 = vector.load %arg4[%c0_4, %c0_5] : memref<256x64xbf16, #tpu.memory_space<vmem>>, vector<256x64xbf16>
    %cst = arith.constant dense<0.000000e+00> : vector<256x64xf32>
    %6 = tpu.matmul %4, %5, %cst {dimension_numbers = #tpu.dot_dimension_numbers<[1], [0], [0], [1], [0, 0, 1, 1], [], []>} : vector<256x256xbf16>, vector<256x64xbf16>, vector<256x64xf32> -> vector<256x64xf32>
    %7 = arith.addf %3, %6 : vector<256x64xf32>
    %c0_6 = arith.constant 0 : index
    %c0_7 = arith.constant 0 : index
    %8 = vector.load %arg7[%c0_6, %c0_7] : memref<256x64xf32, #tpu.memory_space<vmem>>, vector<256x64xf32>
    tpu.vector_store %arg7[%c0_6, %c0_7], %7 {strides = array<i32>} : memref<256x64xf32, #tpu.memory_space<vmem>>, vector<256x64xf32>,
    %c0_i32_8 = arith.constant 0 : i32
    %9 = arith.cmpi eq, %arg2, %c0_i32_8 : i32
    %10 = arith.extui %9 : i1 to i32
    %c0_i32_9 = arith.constant 0 : i32
    %11 = arith.cmpi ne, %10, %c0_i32_9 : i32
    scf.if %11 {
      %c0_10 = arith.constant 0 : index
      %c0_11 = arith.constant 0 : index
      %12 = vector.load %arg7[%c0_10, %c0_11] : memref<256x64xf32, #tpu.memory_space<vmem>>, vector<256x64xf32>
      %c0_12 = arith.constant 0 : index
      %c0_13 = arith.constant 0 : index
      %13 = vector.load %arg5[%c0_12, %c0_13] : memref<1x64xf32, #tpu.memory_space<vmem>>, vector<1x64xf32>
      %14 = vector.broadcast %13 : vector<1x64xf32> to vector<256x64xf32>
      %15 = arith.addf %12, %14 : vector<256x64xf32>
      %cst_14 = arith.constant 0.000000e+00 : f32
      %16 = vector.broadcast %cst_14 : f32 to vector<256x64xf32>
      %17 = arith.maximumf %15, %16 : vector<256x64xf32>
      %18 = arith.truncf %17 : vector<256x64xf32> to vector<256x64xbf16>
      %c0_15 = arith.constant 0 : index
      %c0_16 = arith.constant 0 : index
      %19 = vector.load %arg6[%c0_15, %c0_16] : memref<256x64xbf16, #tpu.memory_space<vmem>>, vector<256x64xbf16>
      tpu.vector_store %arg6[%c0_15, %c0_16], %18 {strides = array<i32>} : memref<256x64xbf16, #tpu.memory_space<vmem>>, vector<256x64xbf16>,
    } else {
    }
    return
  }
  func.func @transform_0(%arg0: i32, %arg1: i32, %arg2: i32) -> (i32, i32) {
    %c0_i32 = arith.constant 0 : i32
    return %arg0, %arg2 : i32, i32
  }
  func.func @transform_1(%arg0: i32, %arg1: i32, %arg2: i32) -> (i32, i32) {
    %c0_i32 = arith.constant 0 : i32
    return %arg2, %arg1 : i32, i32
  }
  func.func @transform_2(%arg0: i32, %arg1: i32, %arg2: i32) -> (i32, i32) {
    %c0_i32 = arith.constant 0 : i32
    %c0_i32_0 = arith.constant 0 : i32
    return %c0_i32, %arg1 : i32, i32
  }
  func.func @transform_3(%arg0: i32, %arg1: i32, %arg2: i32) -> (i32, i32) {
    %c0_i32 = arith.constant 0 : i32
    return %arg0, %arg1 : i32, i32
  }
}

</mosaic_0001>

<bundles_post_ra>
// kernel: mm_affine.1
= control target key start
LH: loop header
LB: loop body
LE: loop exit
PB: predicated region body
PF: predicated region fallthrough
CT: control target
= control target key end

     0   :  { %s1654_s12 = smov 0   ;;  %s1656_s13 = smov 0   ;;  %s1940_s0 = inlined_call_operand.vmem [shape: bf16[512,256], index: 0, kind: input, shape index: {}]   ;;  %s1941_s1 = inlined_call_operand.vmem [shape: bf16[256,64], index: 1, kind: input, shape index: {}]   ;;  %s1942_s2 = inlined_call_operand.vmem [shape: f32[1,64], index: 2, kind: input, shape index: {}]   ;;  %s1943_s3 = inlined_call_operand.vmem [shape: bf16[512,64], index: 3, kind: output, shape index: {}]  }
   0x1   :  { %s1658_s14 = smov 0  }
   0x2 LB: > { %s32_s15 = sadd.s32 1, %s1627_s13  ;;  %p1270_p0 = scmp.ge.s32.totalorder %s1631_s14, 1  ;;  %s1631_s14 = sphi %s1658_s14, %s13_s14   ;;  %s1627_s13 = sphi %s1656_s13, %s1945_s13   ;;  %s1623_s12 = sphi %s1654_s12, %s1944_s12  }
   0x3   : > { %p34_p1 = scmp.ge.s32.totalorder %s32_s15, 2  ;;  %p191_p2 = scmp.lt.s32.totalorder %s1631_s14, 3 }
   0x5   : > { %s1947_s15 = smov (%p34_p1, %s32_s15), 0  ;;  %p192_p3 = pnand %p1270_p0, %p191_p2 }
   0x6   : > { %v1545_v0 = vld [vmem:[%s1941_s1 + $0x40] sm:$0xff] (!%p192_p3)   ;;  %s1271_s18 = sshll.u32 (!%p192_p3), %s1623_s12, 5  ;;  %v1547_v2 = vld [vmem:[%s1941_s1 + $0x48] sm:$0xff] (!%p192_p3)   ;;  %v1549_v4 = vld [vmem:[%s1941_s1 + $0x50] sm:$0xff] (!%p192_p3)   ;;  %vm272_vm0 = vcmask (!%p192_p3), 523264   ;;  %v1633_v48 = vmov (!%p192_p3), 0.0  }
   0x7   : > { %195 = sbr.rel (%p192_p3) target bundleno = 332 (0x14c), region = 32  ;;  %v1546_v1 = vld [vmem:[%s1941_s1] sm:$0xff] (!%p192_p3)   ;;  %1392 = vmatprep.subr.bf16.mxu0 (!%p192_p3), %v1545_v0  ;;  %1504 = vmatprep.subr.bf16.mxu1 (!%p192_p3), %v1545_v0  ;;  %v1548_v3 = vld [vmem:[%s1941_s1 + $0x8] sm:$0xff] (!%p192_p3)   ;;  %p236_p4 = scmp.lt.s32.totalorder (!%p192_p3), %s1271_s18, 63  ;;  %v1550_v5 = vld [vmem:[%s1941_s1 + $0x10] sm:$0xff] (!%p192_p3)   ;;  %273 = vst.msk [vmem:[#allocation2] sm:$0xff] (!%p192_p3), %vm272_vm0, %v1633_v48 }
   0x8   : > { %1393 = vmatpush3.bf16.msra.mxu0 (!%p192_p3), %v1546_v1  ;;  %1512 = vmatpush3.bf16.msra.mxu1 (!%p192_p3), %v1546_v1  ;;  %v1551_v6 = vld [vmem:[%s1941_s1 + $0x58] sm:$0xff] (!%p192_p3)   ;;  %v1553_v8 = vld [vmem:[%s1941_s1 + $0x60] sm:$0xff] (!%p192_p3)   ;;  %v1555_v10 = vld [vmem:[%s1941_s1 + $0x68] sm:$0xff] (!%p192_p3)   ;;  %274 = vst.msk [vmem:[#allocation2 + $0x8] sm:$0xff] (!%p192_p3), %vm272_vm0, %v1633_v48  ;;  %vm1117_vm1 = vcmask (!%p192_p3), 519168  }
   0x9   : > { %1394 = vmatprep.subr.bf16.mxu0 (!%p192_p3), %v1547_v2  ;;  %1505 = vmatprep.subr.bf16.mxu1 (!%p192_p3), %v1547_v2  ;;  %v1552_v7 = vld [vmem:[%s1941_s1 + $0x18] sm:$0xff] (!%p192_p3)   ;;  %v1554_v9 = vld [vmem:[%s1941_s1 + $0x20] sm:$0xff] (!%p192_p3)   ;;  %v1556_v13 = vld [vmem:[%s1941_s1 + $0x28] sm:$0xff] (!%p192_p3)   ;;  %275 = vst.msk [vmem:[#allocation2 + $0x10] sm:$0xff] (!%p192_p3), %vm272_vm0, %v1633_v48 }
   0xa   : > { %v1557_v14 = vld [vmem:[%s1941_s1 + $0x70] sm:$0xff] (!%p192_p3)   ;;  %v1559_v16 = vld [vmem:[%s1941_s1 + $0x78] sm:$0xff] (!%p192_p3)   ;;  %276 = vst.msk [vmem:[#allocation2 + $0x18] sm:$0xff] (!%p192_p3), %vm272_vm0, %v1633_v48  ;;  %277 = vst.msk [vmem:[#allocation2 + $0x20] sm:$0xff] (!%p192_p3), %vm272_vm0, %v1633_v48 }
   0xb   : > { %v1558_v15 = vld [vmem:[%s1941_s1 + $0x30] sm:$0xff] (!%p192_p3)   ;;  %v1560_v17 = vld [vmem:[%s1941_s1 + $0x38] sm:$0xff] (!%p192_p3)   ;;  %278 = vst.msk [vmem:[#allocation2 + $0x28] sm:$0xff] (!%p192_p3), %vm272_vm0, %v1633_v48  ;;  %279 = vst.msk [vmem:[#allocation2 + $0x30] sm:$0xff] (!%p192_p3), %vm272_vm0, %v1633_v48 }
   0xc   : > { %1395 = vmatpush3.bf16.msra.mxu0 (!%p192_p3), %v1548_v3  ;;  %1513 = vmatpush3.bf16.msra.mxu1 (!%p192_p3), %v1548_v3  ;;  %280 = vst.msk [vmem:[#allocation2 + $0x38] sm:$0xff] (!%p192_p3), %vm272_vm0, %v1633_v48  ;;  %281 = vst.msk [vmem:[#allocation2 + $0x40] sm:$0xff] (!%p192_p3), %vm272_vm0, %v1633_v48 }
   0xd   : > { %1396 = vmatprep.subr.bf16.mxu0 (!%p192_p3), %v1549_v4  ;;  %1506 = vmatprep.subr.bf16.mxu1 (!%p192_p3), %v1549_v4  ;;  %282 = vst.msk [vmem:[#allocation2 + $0x48] sm:$0xff] (!%p192_p3), %vm272_vm0, %v1633_v48  ;;  %283 = vst.msk [vmem:[#allocation2 + $0x50] sm:$0xff] (!%p192_p3), %vm272_vm0, %v1633_v48 }
   0xe   : > { %s1949_s18 = smov (!%p236_p4, %s1271_s18), 63  ;;  %284 = vst.msk [vmem:[#allocation2 + $0x58] sm:$0xff] %vm272_vm0, %v1633_v48  ;;  %285 = vst.msk [vmem:[#allocation2 + $0x60] sm:$0xff] %vm272_vm0, %v1633_v48  ;;  %v305_v51 = vld [vmem:[#allocation2] sm:$0xff] }
   0xf   : > { %s1359_s6 = sshll.u32 %s1949_s18, 3  ;;  %286 = vst.msk [vmem:[#allocation2 + $0x68] sm:$0xff] %vm272_vm0, %v1633_v48  ;;  %287 = vst.msk [vmem:[#allocation2 + $0x70] sm:$0xff] %vm272_vm0, %v1633_v48  ;;  %v306_v59 = vld [vmem:[#allocation2 + $0x8] sm:$0xff]  ;;  %s1275_s5 = sshll.u32 %s1949_s18, 2 }
  0x10   : > { %1397 = vmatpush3.bf16.msra.mxu0 %v1550_v5  ;;  %1514 = vmatpush3.bf16.msra.mxu1 %v1550_v5  ;;  %s1705_s11 = scalar_lea.vmem %s1940_s0, %s1359_s6  ;;  %288 = vst.msk [vmem:[#allocation2 + $0x78] sm:$0xff] %vm272_vm0, %v1633_v48  ;;  %289 = vst.msk [vmem:[#allocation2 + $0x80] sm:$0xff] %vm272_vm0, %v1633_v48  ;;  %s1813_s7 = scalar_lea.vmem %s1943_s3, %s1275_s5 }
  0x11   : > { %1398 = vmatprep.subr.bf16.mxu0 %v1551_v6  ;;  %1507 = vmatprep.subr.bf16.mxu1 %v1551_v6  ;;  %v1563_v11 = vld [vmem:[%s1705_s11 + $0x4] ss:$8 sps:$4 sm:$0xff]   ;;  %v1561_v18 = vld [vmem:[%s1705_s11] ss:$8 sps:$4 sm:$0xff]   ;;  %v1567_v20 = vld [vmem:[%s1705_s11 + $0x14] ss:$8 sps:$4 sm:$0xff]  }
  0x12   : > { %v1566_v12 = vld [vmem:[%s1705_s11 + $0x84] ss:$8 sps:$4 sm:$0xff]   ;;  %689 = vmatprep.mubr.bf16.mxu0 %v1563_v11  ;;  %v1564_v19 = vld [vmem:[%s1705_s11 + $0x80] ss:$8 sps:$4 sm:$0xff]   ;;  %v1569_v21 = vld [vmem:[%s1705_s11 + $0x94] ss:$8 sps:$4 sm:$0xff]  }
  0x13   : > { %753 = vmatprep.mubr.bf16.mxu1 %v1566_v12  ;;  %v1571_v22 = vld [vmem:[%s1705_s11 + $0x10] ss:$8 sps:$4 sm:$0xff]   ;;  %v1573_v24 = vld [vmem:[%s1705_s11 + $0x24] ss:$8 sps:$4 sm:$0xff]   ;;  %v1577_v26 = vld [vmem:[%s1705_s11 + $0x20] ss:$8 sps:$4 sm:$0xff]  }
  0x14   : > { %1399 = vmatpush3.bf16.msra.mxu0 %v1552_v7  ;;  %1515 = vmatpush3.bf16.msra.mxu1 %v1552_v7  ;;  %v1572_v23 = vld [vmem:[%s1705_s11 + $0x90] ss:$8 sps:$4 sm:$0xff]   ;;  %v1575_v25 = vld [vmem:[%s1705_s11 + $0xa4] ss:$8 sps:$4 sm:$0xff]   ;;  %v1578_v27 = vld [vmem:[%s1705_s11 + $0xa0] ss:$8 sps:$4 sm:$0xff]  }
  0x15   : > { %1400 = vmatprep.subr.bf16.mxu0 %v1553_v8  ;;  %1508 = vmatprep.subr.bf16.mxu1 %v1553_v8  ;;  %v1579_v28 = vld [vmem:[%s1705_s11 + $0x34] ss:$8 sps:$4 sm:$0xff]   ;;  %v1583_v30 = vld [vmem:[%s1705_s11 + $0x30] ss:$8 sps:$4 sm:$0xff]   ;;  %v1585_v32 = vld [vmem:[%s1705_s11 + $0x44] ss:$8 sps:$4 sm:$0xff]  }
  0x16   : > { %v1581_v29 = vld [vmem:[%s1705_s11 + $0xb4] ss:$8 sps:$4 sm:$0xff]   ;;  %v1584_v31 = vld [vmem:[%s1705_s11 + $0xb0] ss:$8 sps:$4 sm:$0xff]   ;;  %v1587_v33 = vld [vmem:[%s1705_s11 + $0xc4] ss:$8 sps:$4 sm:$0xff]  }
  0x17   : > { %v1589_v34 = vld [vmem:[%s1705_s11 + $0x40] ss:$8 sps:$4 sm:$0xff]   ;;  %v1591_v36 = vld [vmem:[%s1705_s11 + $0x54] ss:$8 sps:$4 sm:$0xff]   ;;  %v1595_v38 = vld [vmem:[%s1705_s11 + $0x50] ss:$8 sps:$4 sm:$0xff]  }
  0x18   : > { %1401 = vmatpush3.bf16.msra.mxu0 %v1554_v9  ;;  %1516 = vmatpush3.bf16.msra.mxu1 %v1554_v9  ;;  %v1590_v35 = vld [vmem:[%s1705_s11 + $0xc0] ss:$8 sps:$4 sm:$0xff]   ;;  %v1593_v37 = vld [vmem:[%s1705_s11 + $0xd4] ss:$8 sps:$4 sm:$0xff]   ;;  %v1596_v39 = vld [vmem:[%s1705_s11 + $0xd0] ss:$8 sps:$4 sm:$0xff]  }
  0x19   : > { %1402 = vmatprep.subr.bf16.mxu0 %v1555_v10  ;;  %1509 = vmatprep.subr.bf16.mxu1 %v1555_v10  ;;  %v1597_v40 = vld [vmem:[%s1705_s11 + $0x64] ss:$8 sps:$4 sm:$0xff]   ;;  %v1601_v42 = vld [vmem:[%s1705_s11 + $0x60] ss:$8 sps:$4 sm:$0xff]   ;;  %v1603_v44 = vld [vmem:[%s1705_s11 + $0x74] ss:$8 sps:$4 sm:$0xff]  }
  0x1a   : > { %v1599_v41 = vld [vmem:[%s1705_s11 + $0xe4] ss:$8 sps:$4 sm:$0xff]   ;;  %v1602_v43 = vld [vmem:[%s1705_s11 + $0xe0] ss:$8 sps:$4 sm:$0xff]   ;;  %v1605_v45 = vld [vmem:[%s1705_s11 + $0xf4] ss:$8 sps:$4 sm:$0xff]  }
  0x1b   : > { %v1607_v46 = vld [vmem:[%s1705_s11 + $0x70] ss:$8 sps:$4 sm:$0xff]   ;;  %290 = vst.msk [vmem:[#allocation2 + $0x88] sm:$0xff] %vm272_vm0, %v1633_v48  ;;  %291 = vst.msk [vmem:[#allocation2 + $0x90] sm:$0xff] %vm272_vm0, %v1633_v48  ;;  %v321_v53 = vld [vmem:[#allocation2 + $0x80] sm:$0xff] }
  0x1c   : > { %1403 = vmatpush3.bf16.msra.mxu0 %v1556_v13  ;;  %1517 = vmatpush3.bf16.msra.mxu1 %v1556_v13  ;;  %v1608_v47 = vld [vmem:[%s1705_s11 + $0xf0] ss:$8 sps:$4 sm:$0xff]   ;;  %292 = vst.msk [vmem:[#allocation2 + $0x98] sm:$0xff] %vm272_vm0, %v1633_v48  ;;  %293 = vst.msk [vmem:[#allocation2 + $0xa0] sm:$0xff] %vm272_vm0, %v1633_v48 }
  0x1d   : > { %1404 = vmatprep.subr.bf16.mxu0 %v1557_v14  ;;  %1510 = vmatprep.subr.bf16.mxu1 %v1557_v14  ;;  %294 = vst.msk [vmem:[#allocation2 + $0xa8] sm:$0xff] %vm272_vm0, %v1633_v48  ;;  %295 = vst.msk [vmem:[#allocation2 + $0xb0] sm:$0xff] %vm272_vm0, %v1633_v48  ;;  %v307_v7 = vld [vmem:[#allocation2 + $0x10] sm:$0xff] }
  0x1e   : > { %296 = vst.msk [vmem:[#allocation2 + $0xb8] sm:$0xff] %vm272_vm0, %v1633_v48  ;;  %297 = vst.msk [vmem:[#allocation2 + $0xc0] sm:$0xff] %vm272_vm0, %v1633_v48 }
  0x1f   : > { %298 = vst.msk [vmem:[#allocation2 + $0xc8] sm:$0xff] %vm272_vm0, %v1633_v48  ;;  %299 = vst.msk [vmem:[#allocation2 + $0xd0] sm:$0xff] %vm272_vm0, %v1633_v48 }
  0x20   : > { %1405 = vmatpush3.bf16.msra.mxu0 %v1558_v15  ;;  %1518 = vmatpush3.bf16.msra.mxu1 %v1558_v15  ;;  %300 = vst.msk [vmem:[#allocation2 + $0xd8] sm:$0xff] %vm272_vm0, %v1633_v48  ;;  %301 = vst.msk [vmem:[#allocation2 + $0xe0] sm:$0xff] %vm272_vm0, %v1633_v48  ;;  %v1799_v15 = vld [vmem:[%s1942_s2] ss:$0 sm:$0xff] }
  0x21   : > { %1406 = vmatprep.subr.bf16.mxu0 %v1559_v16  ;;  %1511 = vmatprep.subr.bf16.mxu1 %v1559_v16  ;;  %302 = vst.msk [vmem:[#allocation2 + $0xe8] sm:$0xff] %vm272_vm0, %v1633_v48  ;;  %303 = vst.msk [vmem:[#allocation2 + $0xf0] sm:$0xff] %vm272_vm0, %v1633_v48  ;;  %v308_v16 = vld [vmem:[#allocation2 + $0x18] sm:$0xff] }
  0x22   : > { %304 = vst.msk [vmem:[#allocation2 + $0xf8] sm:$0xff] %vm272_vm0, %v1633_v48  ;;  %v322_v61 = vld [vmem:[#allocation2 + $0x88] sm:$0xff]  ;;  %v323_v9 = vld [vmem:[#allocation2 + $0x90] sm:$0xff] }
  0x24   : > { %1407 = vmatpush3.bf16.msra.mxu0 %v1560_v17  ;;  %1519 = vmatpush3.bf16.msra.mxu1 %v1560_v17 }
  0x27   : > { %690 = vmatmul.mubr.bf16.vlgmr.msra.gmra.mrb[0].mxu0 %v1561_v18  ;;  %754 = vmatmul.mubr.bf16.vlgmr.msra.gmra.mrb[0].mxu1 %v1564_v19  ;;  %v324_v18 = vld [vmem:[#allocation2 + $0x98] sm:$0xff] }
  0x28   : > { %697 = vmatprep.mubr.bf16.mxu0 %v1567_v20  ;;  %761 = vmatprep.mubr.bf16.mxu1 %v1569_v21 }
  0x2f   : > { %698 = vmatmul.mubr.bf16.gmra.mrb[4].mxu0 %v1571_v22  ;;  %762 = vmatmul.mubr.bf16.gmra.mrb[4].mxu1 %v1572_v23 }
  0x30   : > { %705 = vmatprep.mubr.bf16.mxu0 %v1573_v24  ;;  %769 = vmatprep.mubr.bf16.mxu1 %v1575_v25 }
  0x37   : > { %706 = vmatmul.mubr.bf16.gmra.mrb[8].mxu0 %v1577_v26  ;;  %770 = vmatmul.mubr.bf16.gmra.mrb[8].mxu1 %v1578_v27 }
  0x38   : > { %713 = vmatprep.mubr.bf16.mxu0 %v1579_v28  ;;  %777 = vmatprep.mubr.bf16.mxu1 %v1581_v29 }
  0x3f   : > { %714 = vmatmul.mubr.bf16.gmra.mrb[12].mxu0 %v1583_v30  ;;  %778 = vmatmul.mubr.bf16.gmra.mrb[12].mxu1 %v1584_v31 }
  0x40   : > { %721 = vmatprep.mubr.bf16.mxu0 %v1585_v32  ;;  %785 = vmatprep.mubr.bf16.mxu1 %v1587_v33 }
  0x47   : > { %722 = vmatmul.mubr.bf16.gmra.mrb[16].mxu0 %v1589_v34  ;;  %786 = vmatmul.mubr.bf16.gmra.mrb[16].mxu1 %v1590_v35 }
  0x48   : > { %729 = vmatprep.mubr.bf16.mxu0 %v1591_v36  ;;  %793 = vmatprep.mubr.bf16.mxu1 %v1593_v37 }
  0x4f   : > { %730 = vmatmul.mubr.bf16.gmra.mrb[20].mxu0 %v1595_v38  ;;  %794 = vmatmul.mubr.bf16.gmra.mrb[20].mxu1 %v1596_v39 }
  0x50   : > { %737 = vmatprep.mubr.bf16.mxu0 %v1597_v40  ;;  %801 = vmatprep.mubr.bf16.mxu1 %v1599_v41 }
  0x57   : > { %738 = vmatmul.mubr.bf16.gmra.mrb[24].mxu0 %v1601_v42  ;;  %802 = vmatmul.mubr.bf16.gmra.mrb[24].mxu1 %v1602_v43 }
  0x58   : > { %745 = vmatprep.mubr.bf16.mxu0 %v1603_v44  ;;  %809 = vmatprep.mubr.bf16.mxu1 %v1605_v45  ;;  %v309_v44 = vld [vmem:[#allocation2 + $0x20] sm:$0xff] }
  0x59   : > { %v325_v45 = vld [vmem:[#allocation2 + $0xa0] sm:$0xff] }
  0x5f   : > { %746 = vmatmul.mubr.bf16.gmra.mrb[28].mxu0 %v1607_v46  ;;  %810 = vmatmul.mubr.bf16.gmra.mrb[28].mxu1 %v1608_v47 }
  0xfa   : > { %v1408_v49 = vpop.f32.mrb[0].mxu0  ;;  %v1456_v50 = vpop.f32.mrb[0].mxu1 }
  0xfb   : > { %v1409_v52 = vpop.f32.mrb[1].mxu0  ;;  %v1457_v54 = vpop.f32.mrb[1].mxu1 }
  0xfc   : > { %v1410_v55 = vadd.f32 %v1409_v52, %v1408_v49  ;;  %v1458_v56 = vadd.f32 %v1457_v54, %v1456_v50  ;;  %v1411_v57 = vpop.f32.mrb[2].mxu0  ;;  %v1459_v58 = vpop.f32.mrb[2].mxu1  ;;  %v310_v50 = vld [vmem:[#allocation2 + $0x28] sm:$0xff] }
  0xfd   : > { %v1412_v60 = vpop.f32.mrb[3].mxu0  ;;  %v1460_v62 = vpop.f32.mrb[3].mxu1  ;;  %v326_v52 = vld [vmem:[#allocation2 + $0xa8] sm:$0xff] }
  0xfe   : > { %v818_v63 = vadd.f32 %v1410_v55, %v305_v51  ;;  %v834_v0 = vadd.f32 %v1458_v56, %v321_v53  ;;  %v1413_v1 = vadd.f32 %v1412_v60, %v1411_v57  ;;  %v1461_v2 = vadd.f32 %v1460_v62, %v1459_v58 }
 0x100   : > { %851 = vst.msk [vmem:[#allocation2] sm:$0xff] %vm272_vm0, %v818_v63  ;;  %867 = vst.msk [vmem:[#allocation2 + $0x80] sm:$0xff] %vm272_vm0, %v834_v0  ;;  %v819_v3 = vadd.f32 %v1413_v1, %v306_v59  ;;  %v835_v4 = vadd.f32 %v1461_v2, %v322_v61 }
 0x102   : > { %852 = vst.msk [vmem:[#allocation2 + $0x8] sm:$0xff] %vm272_vm0, %v819_v3  ;;  %868 = vst.msk [vmem:[#allocation2 + $0x88] sm:$0xff] %vm272_vm0, %v835_v4  ;;  %v1414_v5 = vpop.f32.mrb[4].mxu0  ;;  %v1462_v6 = vpop.f32.mrb[4].mxu1 }
 0x103   : > { %v1415_v8 = vpop.f32.mrb[5].mxu0  ;;  %v1463_v10 = vpop.f32.mrb[5].mxu1 }
 0x104   : > { %v1416_v11 = vadd.f32 %v1415_v8, %v1414_v5  ;;  %v1464_v12 = vadd.f32 %v1463_v10, %v1462_v6  ;;  %v1417_v13 = vpop.f32.mrb[6].mxu0  ;;  %v1465_v14 = vpop.f32.mrb[6].mxu1 }
 0x105   : > { %v1418_v17 = vpop.f32.mrb[7].mxu0  ;;  %v1466_v19 = vpop.f32.mrb[7].mxu1 }
 0x106   : > { %v820_v20 = vadd.f32 %v1416_v11, %v307_v7  ;;  %v836_v21 = vadd.f32 %v1464_v12, %v323_v9  ;;  %v1419_v22 = vadd.f32 %v1418_v17, %v1417_v13  ;;  %v1467_v23 = vadd.f32 %v1466_v19, %v1465_v14  ;;  %v311_v17 = vld [vmem:[#allocation2 + $0x30] sm:$0xff] }
 0x107   : > { %v886_v24 = vld [vmem:[#allocation2] sm:$0xff] }
 0x108   : > { %v902_v25 = vld [vmem:[#allocation2 + $0x80] sm:$0xff]  ;;  %v925_v26 = vadd.f32 %v1799_v15, %v886_v24  ;;  %853 = vst.msk [vmem:[#allocation2 + $0x10] sm:$0xff] %vm272_vm0, %v820_v20  ;;  %869 = vst.msk [vmem:[#allocation2 + $0x90] sm:$0xff] %vm272_vm0, %v836_v21  ;;  %v821_v28 = vadd.f32 %v1419_v22, %v308_v16  ;;  %v837_v29 = vadd.f32 %v1467_v23, %v324_v18  ;;  %v327_v18 = vld [vmem:[#allocation2 + $0xb0] sm:$0xff] }
 0x109   : > { %v941_v27 = vadd.f32 %v1799_v15, %v902_v25  ;;  %v887_v30 = vld [vmem:[#allocation2 + $0x8] sm:$0xff]  ;;  %v312_v23 = vld [vmem:[#allocation2 + $0x38] sm:$0xff] }
 0x10a   : > { %v903_v31 = vld [vmem:[#allocation2 + $0x88] sm:$0xff]  ;;  %v957_v32 = vmax.f32 %v925_v26, 0.0  ;;  %v926_v34 = vadd.f32 %v1799_v15, %v887_v30  ;;  %854 = vst.msk [vmem:[#allocation2 + $0x18] sm:$0xff] %vm272_vm0, %v821_v28  ;;  %870 = vst.msk [vmem:[#allocation2 + $0x98] sm:$0xff] %vm272_vm0, %v837_v29  ;;  %v1420_v36 = vpop.f32.mrb[8].mxu0  ;;  %v1468_v37 = vpop.f32.mrb[8].mxu1 }
 0x10b   : > { %v973_v33 = vmax.f32 %v941_v27, 0.0  ;;  %v942_v35 = vadd.f32 %v1799_v15, %v903_v31  ;;  %v1421_v38 = vpop.f32.mrb[9].mxu0  ;;  %v1469_v39 = vpop.f32.mrb[9].mxu1  ;;  %v328_v25 = vld [vmem:[#allocation2 + $0xb8] sm:$0xff] }
 0x10c   : > { %v1360_v40 = vpack.c.bf16 %v957_v32, %v957_v32  ;;  %v958_v42 = vmax.f32 %v926_v34, 0.0  ;;  %v1423_v46 = vpop.f32.mrb[10].mxu0  ;;  %v1471_v47 = vpop.f32.mrb[10].mxu1  ;;  %v1422_v48 = vadd.f32 %v1421_v38, %v1420_v36  ;;  %v1470_v49 = vadd.f32 %v1469_v39, %v1468_v37 }
 0x10d   : > { %v1376_v41 = vpack.c.bf16 %v973_v33, %v973_v33  ;;  %v974_v43 = vmax.f32 %v942_v35, 0.0  ;;  %v1424_v51 = vpop.f32.mrb[11].mxu0  ;;  %v1472_v53 = vpop.f32.mrb[11].mxu1 }
 0x10e   : > { %1118 = vst.msk [vmem:[%s1813_s7] sm:$0xf] %vm1117_vm1, %v1360_v40  ;;  %v1361_v54 = vpack.c.bf16 %v958_v42, %v958_v42  ;;  %v1425_v56 = vadd.f32 %v1424_v51, %v1423_v46  ;;  %v1473_v57 = vadd.f32 %v1472_v53, %v1471_v47  ;;  %v822_v60 = vadd.f32 %v1422_v48, %v309_v44  ;;  %v313_v47 = vld [vmem:[#allocation2 + $0x40] sm:$0xff] }
 0x10f   : > { %1134 = vst.msk [vmem:[%s1813_s7 + $0x40] sm:$0xf] %vm1117_vm1, %v1376_v41  ;;  %v1377_v55 = vpack.c.bf16 %v974_v43, %v974_v43  ;;  %v888_v58 = vld [vmem:[#allocation2 + $0x10] sm:$0xff]  ;;  %v838_v61 = vadd.f32 %v1470_v49, %v325_v45  ;;  %v329_v49 = vld [vmem:[#allocation2 + $0xc0] sm:$0xff] }
 0x110   : > { %v904_v59 = vld [vmem:[#allocation2 + $0x90] sm:$0xff]  ;;  %1119 = vst.msk [vmem:[%s1813_s7 + $0x4] sm:$0xf] %vm1117_vm1, %v1361_v54  ;;  %v927_v62 = vadd.f32 %v1799_v15, %v888_v58  ;;  %v823_v0 = vadd.f32 %v1425_v56, %v310_v50  ;;  %v839_v1 = vadd.f32 %v1473_v57, %v326_v52 }
 0x111   : > { %1135 = vst.msk [vmem:[%s1813_s7 + $0x44] sm:$0xf] %vm1117_vm1, %v1377_v55  ;;  %v943_v63 = vadd.f32 %v1799_v15, %v904_v59  ;;  %v889_v2 = vld [vmem:[#allocation2 + $0x18] sm:$0xff] }
 0x112   : > { %v905_v3 = vld [vmem:[#allocation2 + $0x98] sm:$0xff]  ;;  %855 = vst.msk [vmem:[#allocation2 + $0x20] sm:$0xff] %vm272_vm0, %v822_v60  ;;  %871 = vst.msk [vmem:[#allocation2 + $0xa0] sm:$0xff] %vm272_vm0, %v838_v61  ;;  %v959_v4 = vmax.f32 %v927_v62, 0.0  ;;  %v928_v6 = vadd.f32 %v1799_v15, %v889_v2  ;;  %v1426_v8 = vpop.f32.mrb[12].mxu0  ;;  %v1474_v9 = vpop.f32.mrb[12].mxu1 }
 0x113   : > { %v975_v5 = vmax.f32 %v943_v63, 0.0  ;;  %v944_v7 = vadd.f32 %v1799_v15, %v905_v3  ;;  %856 = vst.msk [vmem:[#allocation2 + $0x28] sm:$0xff] %vm272_vm0, %v823_v0  ;;  %872 = vst.msk [vmem:[#allocation2 + $0xa8] sm:$0xff] %vm272_vm0, %v839_v1  ;;  %v1427_v10 = vpop.f32.mrb[13].mxu0  ;;  %v1475_v11 = vpop.f32.mrb[13].mxu1  ;;  %v314_v1 = vld [vmem:[#allocation2 + $0x48] sm:$0xff] }
 0x114   : > { %v1362_v12 = vpack.c.bf16 %v959_v4, %v959_v4  ;;  %v960_v14 = vmax.f32 %v928_v6, 0.0  ;;  %v1429_v19 = vpop.f32.mrb[14].mxu0  ;;  %v1477_v20 = vpop.f32.mrb[14].mxu1  ;;  %v1428_v21 = vadd.f32 %v1427_v10, %v1426_v8  ;;  %v1476_v22 = vadd.f32 %v1475_v11, %v1474_v9  ;;  %v330_v2 = vld [vmem:[#allocation2 + $0xc8] sm:$0xff] }
 0x115   : > { %v1378_v13 = vpack.c.bf16 %v975_v5, %v975_v5  ;;  %v976_v16 = vmax.f32 %v944_v7, 0.0  ;;  %v1430_v24 = vpop.f32.mrb[15].mxu0  ;;  %v1478_v26 = vpop.f32.mrb[15].mxu1 }
 0x116   : > { %1120 = vst.msk [vmem:[%s1813_s7 + $0x8] sm:$0xf] %vm1117_vm1, %v1362_v12  ;;  %v1363_v27 = vpack.c.bf16 %v960_v14, %v960_v14  ;;  %v1431_v29 = vadd.f32 %v1430_v24, %v1429_v19  ;;  %v1479_v30 = vadd.f32 %v1478_v26, %v1477_v20  ;;  %v824_v31 = vadd.f32 %v1428_v21, %v311_v17  ;;  %v315_v20 = vld [vmem:[#allocation2 + $0x50] sm:$0xff] }
 0x117   : > { %1136 = vst.msk [vmem:[%s1813_s7 + $0x48] sm:$0xf] %vm1117_vm1, %v1378_v13  ;;  %v1379_v28 = vpack.c.bf16 %v976_v16, %v976_v16  ;;  %v840_v32 = vadd.f32 %v1476_v22, %v327_v18  ;;  %v331_v22 = vld [vmem:[#allocation2 + $0xd0] sm:$0xff] }
 0x118   : > { %1121 = vst.msk [vmem:[%s1813_s7 + $0xc] sm:$0xf] %vm1117_vm1, %v1363_v27  ;;  %v825_v35 = vadd.f32 %v1431_v29, %v312_v23  ;;  %v841_v36 = vadd.f32 %v1479_v30, %v328_v25 }
 0x119   : > { %1137 = vst.msk [vmem:[%s1813_s7 + $0x4c] sm:$0xf] %vm1117_vm1, %v1379_v28  ;;  %v890_v33 = vld [vmem:[#allocation2 + $0x20] sm:$0xff] }
 0x11a   : > { %v906_v34 = vld [vmem:[#allocation2 + $0xa0] sm:$0xff]  ;;  %v929_v37 = vadd.f32 %v1799_v15, %v890_v33  ;;  %v891_v39 = vld [vmem:[#allocation2 + $0x28] sm:$0xff]  ;;  %857 = vst.msk [vmem:[#allocation2 + $0x30] sm:$0xff] %vm272_vm0, %v824_v31  ;;  %873 = vst.msk [vmem:[#allocation2 + $0xb0] sm:$0xff] %vm272_vm0, %v840_v32  ;;  %v1432_v43 = vpop.f32.mrb[16].mxu0  ;;  %v1480_v44 = vpop.f32.mrb[16].mxu1 }
 0x11b   : > { %v945_v38 = vadd.f32 %v1799_v15, %v906_v34  ;;  %v907_v40 = vld [vmem:[#allocation2 + $0xa8] sm:$0xff]  ;;  %v930_v41 = vadd.f32 %v1799_v15, %v891_v39  ;;  %858 = vst.msk [vmem:[#allocation2 + $0x38] sm:$0xff] %vm272_vm0, %v825_v35  ;;  %874 = vst.msk [vmem:[#allocation2 + $0xb8] sm:$0xff] %vm272_vm0, %v841_v36  ;;  %v1433_v48 = vpop.f32.mrb[17].mxu0  ;;  %v1481_v50 = vpop.f32.mrb[17].mxu1  ;;  %v332_v39 = vld [vmem:[#allocation2 + $0xd8] sm:$0xff] }
 0x11c   : > { %v946_v42 = vadd.f32 %v1799_v15, %v907_v40  ;;  %v961_v45 = vmax.f32 %v929_v37, 0.0  ;;  %v1434_v53 = vadd.f32 %v1433_v48, %v1432_v43  ;;  %v1482_v54 = vadd.f32 %v1481_v50, %v1480_v44  ;;  %v1435_v55 = vpop.f32.mrb[18].mxu0  ;;  %v1483_v56 = vpop.f32.mrb[18].mxu1 }
 0x11d   : > { %v977_v46 = vmax.f32 %v945_v38, 0.0  ;;  %v962_v51 = vmax.f32 %v930_v41, 0.0  ;;  %v1436_v59 = vpop.f32.mrb[19].mxu0  ;;  %v1484_v60 = vpop.f32.mrb[19].mxu1  ;;  %v316_v38 = vld [vmem:[#allocation2 + $0x58] sm:$0xff] }
 0x11e   : > { %v978_v52 = vmax.f32 %v946_v42, 0.0  ;;  %v1364_v57 = vpack.c.bf16 %v961_v45, %v961_v45  ;;  %v826_v63 = vadd.f32 %v1434_v53, %v313_v47  ;;  %v842_v0 = vadd.f32 %v1482_v54, %v329_v49 }
 0x11f   : > { %v1380_v58 = vpack.c.bf16 %v977_v46, %v977_v46  ;;  %v1365_v61 = vpack.c.bf16 %v962_v51, %v962_v51  ;;  %v1437_v3 = vadd.f32 %v1436_v59, %v1435_v55  ;;  %v1485_v4 = vadd.f32 %v1484_v60, %v1483_v56  ;;  %v317_v56 = vld [vmem:[#allocation2 + $0x60] sm:$0xff] }
 0x120   : > { %v1381_v62 = vpack.c.bf16 %v978_v52, %v978_v52  ;;  %1122 = vst.msk [vmem:[%s1813_s7 + $0x10] sm:$0xf] %vm1117_vm1, %v1364_v57 }
 0x121   : > { %1138 = vst.msk [vmem:[%s1813_s7 + $0x50] sm:$0xf] %vm1117_vm1, %v1380_v58  ;;  %1123 = vst.msk [vmem:[%s1813_s7 + $0x14] sm:$0xf] %vm1117_vm1, %v1365_v61  ;;  %v892_v5 = vld [vmem:[#allocation2 + $0x30] sm:$0xff]  ;;  %v827_v11 = vadd.f32 %v1437_v3, %v314_v1  ;;  %v843_v12 = vadd.f32 %v1485_v4, %v330_v2  ;;  %v333_v58 = vld [vmem:[#allocation2 + $0xe0] sm:$0xff] }
 0x122   : > { %1139 = vst.msk [vmem:[%s1813_s7 + $0x54] sm:$0xf] %vm1117_vm1, %v1381_v62  ;;  %v908_v6 = vld [vmem:[#allocation2 + $0xb0] sm:$0xff]  ;;  %v931_v7 = vadd.f32 %v1799_v15, %v892_v5  ;;  %v893_v9 = vld [vmem:[#allocation2 + $0x38] sm:$0xff]  ;;  %v1438_v16 = vpop.f32.mrb[20].mxu0  ;;  %v1486_v17 = vpop.f32.mrb[20].mxu1 }
 0x123   : > { %859 = vst.msk [vmem:[#allocation2 + $0x40] sm:$0xff] %vm272_vm0, %v826_v63  ;;  %875 = vst.msk [vmem:[#allocation2 + $0xc0] sm:$0xff] %vm272_vm0, %v842_v0  ;;  %v947_v8 = vadd.f32 %v1799_v15, %v908_v6  ;;  %v909_v10 = vld [vmem:[#allocation2 + $0xb8] sm:$0xff]  ;;  %v932_v13 = vadd.f32 %v1799_v15, %v893_v9  ;;  %v1439_v21 = vpop.f32.mrb[21].mxu0  ;;  %v1487_v23 = vpop.f32.mrb[21].mxu1  ;;  %v318_v4 = vld [vmem:[#allocation2 + $0x68] sm:$0xff] }
 0x124   : > { %v948_v14 = vadd.f32 %v1799_v15, %v909_v10  ;;  %v963_v18 = vmax.f32 %v931_v7, 0.0  ;;  %860 = vst.msk [vmem:[#allocation2 + $0x48] sm:$0xff] %vm272_vm0, %v827_v11  ;;  %876 = vst.msk [vmem:[#allocation2 + $0xc8] sm:$0xff] %vm272_vm0, %v843_v12  ;;  %v1440_v26 = vadd.f32 %v1439_v21, %v1438_v16  ;;  %v1488_v27 = vadd.f32 %v1487_v23, %v1486_v17  ;;  %v1441_v28 = vpop.f32.mrb[22].mxu0  ;;  %v1489_v29 = vpop.f32.mrb[22].mxu1  ;;  %v334_v6 = vld [vmem:[#allocation2 + $0xe8] sm:$0xff] }
 0x125   : > { %v979_v19 = vmax.f32 %v947_v8, 0.0  ;;  %v964_v24 = vmax.f32 %v932_v13, 0.0  ;;  %v1442_v32 = vpop.f32.mrb[23].mxu0  ;;  %v1490_v33 = vpop.f32.mrb[23].mxu1 }
 0x126   : > { %v980_v25 = vmax.f32 %v948_v14, 0.0  ;;  %v1366_v30 = vpack.c.bf16 %v963_v18, %v963_v18  ;;  %v828_v36 = vadd.f32 %v1440_v26, %v315_v20  ;;  %v844_v37 = vadd.f32 %v1488_v27, %v331_v22 }
 0x127   : > { %v1382_v31 = vpack.c.bf16 %v979_v19, %v979_v19  ;;  %v1367_v34 = vpack.c.bf16 %v964_v24, %v964_v24  ;;  %v1443_v42 = vadd.f32 %v1442_v32, %v1441_v28  ;;  %v1491_v43 = vadd.f32 %v1490_v33, %v1489_v29  ;;  %v319_v29 = vld [vmem:[#allocation2 + $0x70] sm:$0xff] }
 0x128   : > { %v1383_v35 = vpack.c.bf16 %v980_v25, %v980_v25  ;;  %1124 = vst.msk [vmem:[%s1813_s7 + $0x18] sm:$0xf] %vm1117_vm1, %v1366_v30 }
 0x129   : > { %1140 = vst.msk [vmem:[%s1813_s7 + $0x58] sm:$0xf] %vm1117_vm1, %v1382_v31  ;;  %1125 = vst.msk [vmem:[%s1813_s7 + $0x1c] sm:$0xf] %vm1117_vm1, %v1367_v34  ;;  %v829_v46 = vadd.f32 %v1443_v42, %v316_v38  ;;  %v845_v47 = vadd.f32 %v1491_v43, %v332_v39  ;;  %v335_v31 = vld [vmem:[#allocation2 + $0xf0] sm:$0xff]  ;;  %v336_v43 = vld [vmem:[#allocation2 + $0xf8] sm:$0xff] }
 0x12a   : > { %v894_v40 = vld [vmem:[#allocation2 + $0x40] sm:$0xff]  ;;  %1141 = vst.msk [vmem:[%s1813_s7 + $0x5c] sm:$0xf] %vm1117_vm1, %v1383_v35  ;;  %v1444_v52 = vpop.f32.mrb[24].mxu0  ;;  %v1492_v53 = vpop.f32.mrb[24].mxu1 }
 0x12b   : > { %v910_v41 = vld [vmem:[#allocation2 + $0xc0] sm:$0xff]  ;;  %v933_v44 = vadd.f32 %v1799_v15, %v894_v40  ;;  %861 = vst.msk [vmem:[#allocation2 + $0x50] sm:$0xff] %vm272_vm0, %v828_v36  ;;  %877 = vst.msk [vmem:[#allocation2 + $0xd0] sm:$0xff] %vm272_vm0, %v844_v37  ;;  %v895_v50 = vld [vmem:[#allocation2 + $0x48] sm:$0xff]  ;;  %v1445_v57 = vpop.f32.mrb[25].mxu0  ;;  %v1493_v59 = vpop.f32.mrb[25].mxu1 }
 0x12c   : > { %v949_v45 = vadd.f32 %v1799_v15, %v910_v41  ;;  %v911_v51 = vld [vmem:[#allocation2 + $0xc8] sm:$0xff]  ;;  %v934_v54 = vadd.f32 %v1799_v15, %v895_v50  ;;  %862 = vst.msk [vmem:[#allocation2 + $0x58] sm:$0xff] %vm272_vm0, %v829_v46  ;;  %878 = vst.msk [vmem:[#allocation2 + $0xd8] sm:$0xff] %vm272_vm0, %v845_v47  ;;  %v1446_v62 = vadd.f32 %v1445_v57, %v1444_v52  ;;  %v1447_v0 = vpop.f32.mrb[26].mxu0  ;;  %v1495_v1 = vpop.f32.mrb[26].mxu1  ;;  %v320_v41 = vld [vmem:[#allocation2 + $0x78] sm:$0xff] }
 0x12d   : > { %v965_v48 = vmax.f32 %v933_v44, 0.0  ;;  %v950_v55 = vadd.f32 %v1799_v15, %v911_v51  ;;  %v1494_v63 = vadd.f32 %v1493_v59, %v1492_v53  ;;  %v1448_v5 = vpop.f32.mrb[27].mxu0  ;;  %v1496_v7 = vpop.f32.mrb[27].mxu1 }
 0x12e   : > { %v981_v49 = vmax.f32 %v949_v45, 0.0  ;;  %v966_v2 = vmax.f32 %v934_v54, 0.0  ;;  %v830_v8 = vadd.f32 %v1446_v62, %v317_v56  ;;  %v1449_v10 = vadd.f32 %v1448_v5, %v1447_v0 }
 0x12f   : > { %v1368_v60 = vpack.c.bf16 %v965_v48, %v965_v48  ;;  %v982_v3 = vmax.f32 %v950_v55, 0.0  ;;  %v846_v9 = vadd.f32 %v1494_v63, %v333_v58  ;;  %v1497_v11 = vadd.f32 %v1496_v7, %v1495_v1 }
 0x130   : > { %v1384_v61 = vpack.c.bf16 %v981_v49, %v981_v49  ;;  %v1369_v12 = vpack.c.bf16 %v966_v2, %v966_v2  ;;  %863 = vst.msk [vmem:[#allocation2 + $0x60] sm:$0xff] %vm272_vm0, %v830_v8  ;;  %v831_v19 = vadd.f32 %v1449_v10, %v318_v4 }
 0x131   : > { %1126 = vst.msk [vmem:[%s1813_s7 + $0x20] sm:$0xf] %vm1117_vm1, %v1368_v60  ;;  %v1385_v13 = vpack.c.bf16 %v982_v3, %v982_v3  ;;  %v847_v20 = vadd.f32 %v1497_v11, %v334_v6 }
 0x132   : > { %1142 = vst.msk [vmem:[%s1813_s7 + $0x60] sm:$0xf] %vm1117_vm1, %v1384_v61  ;;  %v896_v14 = vld [vmem:[#allocation2 + $0x50] sm:$0xff]  ;;  %1127 = vst.msk [vmem:[%s1813_s7 + $0x24] sm:$0xf] %vm1117_vm1, %v1369_v12  ;;  %v1450_v25 = vpop.f32.mrb[28].mxu0 }
 0x133   : > { %v912_v16 = vld [vmem:[#allocation2 + $0xd0] sm:$0xff]  ;;  %v935_v17 = vadd.f32 %v1799_v15, %v896_v14  ;;  %879 = vst.msk [vmem:[#allocation2 + $0xe0] sm:$0xff] %vm272_vm0, %v846_v9  ;;  %v897_v23 = vld [vmem:[#allocation2 + $0x58] sm:$0xff]  ;;  %864 = vst.msk [vmem:[#allocation2 + $0x68] sm:$0xff] %vm272_vm0, %v831_v19  ;;  %v1498_v26 = vpop.f32.mrb[28].mxu1  ;;  %v1451_v30 = vpop.f32.mrb[29].mxu0 }
 0x134   : > { %v951_v18 = vadd.f32 %v1799_v15, %v912_v16  ;;  %1143 = vst.msk [vmem:[%s1813_s7 + $0x64] sm:$0xf] %vm1117_vm1, %v1385_v13  ;;  %v913_v24 = vld [vmem:[#allocation2 + $0xd8] sm:$0xff]  ;;  %v936_v27 = vadd.f32 %v1799_v15, %v897_v23  ;;  %v1499_v32 = vpop.f32.mrb[29].mxu1  ;;  %v1452_v35 = vadd.f32 %v1451_v30, %v1450_v25  ;;  %v1453_v37 = vpop.f32.mrb[30].mxu0 }
 0x135   : > { %v967_v21 = vmax.f32 %v935_v17, 0.0  ;;  %880 = vst.msk [vmem:[#allocation2 + $0xe8] sm:$0xff] %vm272_vm0, %v847_v20  ;;  %v952_v28 = vadd.f32 %v1799_v15, %v913_v24  ;;  %v1500_v36 = vadd.f32 %v1499_v32, %v1498_v26  ;;  %v1501_v38 = vpop.f32.mrb[30].mxu1  ;;  %v1454_v42 = vpop.f32.mrb[31].mxu0 }
 0x136   : > { %v983_v22 = vmax.f32 %v951_v18, 0.0  ;;  %v968_v39 = vmax.f32 %v936_v27, 0.0  ;;  %v1502_v44 = vpop.f32.mrb[31].mxu1  ;;  %v832_v45 = vadd.f32 %v1452_v35, %v319_v29  ;;  %v1455_v47 = vadd.f32 %v1454_v42, %v1453_v37 }
 0x137   : > { %v1370_v33 = vpack.c.bf16 %v967_v21, %v967_v21  ;;  %v984_v40 = vmax.f32 %v952_v28, 0.0  ;;  %v848_v46 = vadd.f32 %v1500_v36, %v335_v31  ;;  %v1503_v48 = vadd.f32 %v1502_v44, %v1501_v38  ;;  %v898_v51 = vld [vmem:[#allocation2 + $0x60] sm:$0xff] }
 0x138   : > { %v1386_v34 = vpack.c.bf16 %v983_v22, %v983_v22  ;;  %v1371_v49 = vpack.c.bf16 %v968_v39, %v968_v39  ;;  %v937_v53 = vadd.f32 %v1799_v15, %v898_v51  ;;  %865 = vst.msk [vmem:[#allocation2 + $0x70] sm:$0xff] %vm272_vm0, %v832_v45  ;;  %v833_v55 = vadd.f32 %v1455_v47, %v320_v41 }
 0x139   : > { %1128 = vst.msk [vmem:[%s1813_s7 + $0x28] sm:$0xf] %vm1117_vm1, %v1370_v33  ;;  %v1387_v50 = vpack.c.bf16 %v984_v40, %v984_v40  ;;  %v849_v56 = vadd.f32 %v1503_v48, %v336_v43 }
 0x13a   : > { %1144 = vst.msk [vmem:[%s1813_s7 + $0x68] sm:$0xf] %vm1117_vm1, %v1386_v34  ;;  %v914_v52 = vld [vmem:[#allocation2 + $0xe0] sm:$0xff]  ;;  %1129 = vst.msk [vmem:[%s1813_s7 + $0x2c] sm:$0xf] %vm1117_vm1, %v1371_v49  ;;  %v899_v57 = vld [vmem:[#allocation2 + $0x68] sm:$0xff] }
 0x13b   : > { %v953_v54 = vadd.f32 %v1799_v15, %v914_v52  ;;  %881 = vst.msk [vmem:[#allocation2 + $0xf0] sm:$0xff] %vm272_vm0, %v848_v46  ;;  %v969_v59 = vmax.f32 %v937_v53, 0.0  ;;  %v938_v61 = vadd.f32 %v1799_v15, %v899_v57  ;;  %866 = vst.msk [vmem:[#allocation2 + $0x78] sm:$0xff] %vm272_vm0, %v833_v55 }
 0x13c   : > { %1145 = vst.msk [vmem:[%s1813_s7 + $0x6c] sm:$0xf] %vm1117_vm1, %v1387_v50  ;;  %v915_v58 = vld [vmem:[#allocation2 + $0xe8] sm:$0xff] }
 0x13d   : > { %v985_v60 = vmax.f32 %v953_v54, 0.0  ;;  %v954_v62 = vadd.f32 %v1799_v15, %v915_v58  ;;  %882 = vst.msk [vmem:[#allocation2 + $0xf8] sm:$0xff] %vm272_vm0, %v849_v56  ;;  %v1372_v63 = vpack.c.bf16 %v969_v59, %v969_v59  ;;  %v970_v1 = vmax.f32 %v938_v61, 0.0 }
 0x13f   : > { %v1388_v0 = vpack.c.bf16 %v985_v60, %v985_v60  ;;  %v986_v2 = vmax.f32 %v954_v62, 0.0  ;;  %1130 = vst.msk [vmem:[%s1813_s7 + $0x30] sm:$0xf] %vm1117_vm1, %v1372_v63  ;;  %v1373_v3 = vpack.c.bf16 %v970_v1, %v970_v1  ;;  %v900_v5 = vld [vmem:[#allocation2 + $0x70] sm:$0xff] }
 0x140   : > { %v939_v7 = vadd.f32 %v1799_v15, %v900_v5 }
 0x141   : > { %1146 = vst.msk [vmem:[%s1813_s7 + $0x70] sm:$0xf] %vm1117_vm1, %v1388_v0  ;;  %v1389_v4 = vpack.c.bf16 %v986_v2, %v986_v2  ;;  %1131 = vst.msk [vmem:[%s1813_s7 + $0x34] sm:$0xf] %vm1117_vm1, %v1373_v3 }
 0x142   : > { %v916_v6 = vld [vmem:[#allocation2 + $0xf0] sm:$0xff]  ;;  %v901_v9 = vld [vmem:[#allocation2 + $0x78] sm:$0xff]  ;;  %v971_v11 = vmax.f32 %v939_v7, 0.0 }
 0x143   : > { %1147 = vst.msk [vmem:[%s1813_s7 + $0x74] sm:$0xf] %vm1117_vm1, %v1389_v4  ;;  %v955_v8 = vadd.f32 %v1799_v15, %v916_v6  ;;  %v940_v13 = vadd.f32 %v1799_v15, %v901_v9 }
 0x144   : > { %v917_v10 = vld [vmem:[#allocation2 + $0xf8] sm:$0xff]  ;;  %v1374_v16 = vpack.c.bf16 %v971_v11, %v971_v11 }
 0x145   : > { %v987_v12 = vmax.f32 %v955_v8, 0.0  ;;  %v956_v14 = vadd.f32 %v1799_v15, %v917_v10  ;;  %v972_v18 = vmax.f32 %v940_v13, 0.0 }
 0x146   : > { %1132 = vst.msk [vmem:[%s1813_s7 + $0x38] sm:$0xf] %vm1117_vm1, %v1374_v16 }
 0x147   : > { %v1390_v17 = vpack.c.bf16 %v987_v12, %v987_v12  ;;  %v988_v19 = vmax.f32 %v956_v14, 0.0  ;;  %v1375_v20 = vpack.c.bf16 %v972_v18, %v972_v18 }
 0x149   : > { %1148 = vst.msk [vmem:[%s1813_s7 + $0x78] sm:$0xf] %vm1117_vm1, %v1390_v17  ;;  %v1391_v21 = vpack.c.bf16 %v988_v19, %v988_v19  ;;  %1133 = vst.msk [vmem:[%s1813_s7 + $0x3c] sm:$0xf] %vm1117_vm1, %v1375_v20 }
 0x14b   : > { %1149 = vst.msk [vmem:[%s1813_s7 + $0x7c] sm:$0xf] %vm1117_vm1, %v1391_v21 }
 0x14c PF: > { %s13_s14 = sadd.s32 1, %s1631_s14   ;;  %s1944_s12 = smov %s1627_s13 }
 0x14d   : > { %p10_p5 = scmp.ge.s32.totalorder %s13_s14, 4   ;;  %s1945_s13 = smov %s1947_s15 }
 0x14f   :  { %12 = sbr.rel (!%p10_p5) target bundleno = 2 (0x2), region = 76 }

</bundles_post_ra>
